<compile_context>
chip_gen: v5e
topology: v5e:2x2
jax: 0.10.0
libtpu: 0.0.40
codegen_flags: <defaults>
</compile_context>

<pallas_src>
import jax
import jax.numpy as jnp
from jax.experimental import pallas as pl
from jax.experimental.pallas import tpu as pltpu


# ------------------------------ Pallas kernel ------------------------------

def resblock_kernel(x_ref, b1_ref, b2_ref, o_ref):
    """Fused ResBlock on a channels-last slab.

    x_ref  : (NB, H, WC)      f32 input slab (NHWC flattened over (W, Cp))
    b*_ref : (3*WC, WC)       bf16 banded conv weights ([B0; B1; B2] stacked)
    o_ref  : (NB, H, WC)      f32 output slab
    """
    NB, H, WC = o_ref.shape
    x = x_ref[...]                                        # (NB, H, WC) f32

    def band_lhs(v):
        # Build [row h-1 | row h | row h+1] along lanes (vertical zero halo),
        # then flatten batch*rows into the matmul M dim and cast for the MXU.
        zrow = jnp.zeros((NB, 1, WC), v.dtype)
        up = jnp.concatenate([zrow, v[:, :H - 1, :]], axis=1)    # row h-1
        dn = jnp.concatenate([v[:, 1:, :], zrow], axis=1)        # row h+1
        lhs = jnp.concatenate([up, v, dn], axis=-1)              # (NB, H, 3*WC)
        return lhs.reshape(NB * H, 3 * WC).astype(jnp.bfloat16)

    # ---- conv1 (3x3, pad=1) + ReLU: one matmul, K = 3*WC, f32 accumulation --
    h1 = jnp.dot(band_lhs(x), b1_ref[...],
                 preferred_element_type=jnp.float32)             # (NB*H, WC)
    h1 = jnp.maximum(h1, 0.0).reshape(NB, H, WC)

    # ---- conv2 (3x3, pad=1) + residual add (residual kept in f32) -----------
    y = jnp.dot(band_lhs(h1), b2_ref[...],
                preferred_element_type=jnp.float32).reshape(NB, H, WC)
    o_ref[...] = (y + x).astype(o_ref.dtype)


# ------------------------------ weight prep ---------------------------------

def _padded_channels(C, W):
    """Smallest Cp >= C such that W*Cp is a multiple of 128 (lane-dense)."""
    Cp = C
    while (W * Cp) % 128 != 0:
        Cp += 1
    return Cp


def prepare_banded_weights(w_oihw, W, Cp):
    """(C, C, 3, 3) OIHW conv weight -> (3*W*Cp, W*Cp) bf16 banded matrix.

    B[dy, wi*Cp + c, wo*Cp + d] = w[d, c, dy, wi - wo + 1] if |wi - wo| <= 1
    (horizontal taps + horizontal zero padding folded in), the three dy bands
    stacked along rows so one matmul realizes the whole 3x3 conv.
    Built ONCE per weight set, outside the per-step jit.
    """
    C = w_oihw.shape[0]
    w = jnp.zeros((Cp, Cp, 3, 3), jnp.float32).at[:C, :C].set(
        w_oihw.astype(jnp.float32))
    w_hwio = jnp.transpose(w, (2, 3, 1, 0))                  # (3, 3, Cp, Cp)
    wi = jnp.arange(W)[:, None]
    wo = jnp.arange(W)[None, :]
    dx = wi - wo + 1                                         # (W, W)
    valid = ((dx >= 0) & (dx <= 2)).astype(jnp.float32)
    taps = w_hwio[:, jnp.clip(dx, 0, 2)]                     # (3, W, W, Cp, Cp)
    taps = taps * valid[None, :, :, None, None]
    taps = jnp.transpose(taps, (0, 1, 3, 2, 4))              # (3, W, Cp, W, Cp)
    return taps.reshape(3 * W * Cp, W * Cp).astype(jnp.bfloat16)


# -------------------------------- wrappers -----------------------------------

def resblock_forward_slab(x_slab, b1_cat, b2_cat, *, batch_block=None):
    """Hot-path entry: x_slab is the (N, H, W*Cp) f32 channels-last slab."""
    N, H, WC = x_slab.shape
    NB = N if batch_block is None else batch_block   # on v7x use batch_block=N//2
    assert N % NB == 0

    w_spec = pl.BlockSpec((3 * WC, WC), lambda n: (0, 0),
                          pipeline_mode=pl.Buffered(1))   # constant block: 1 buffer
    return pl.pallas_call(
        resblock_kernel,
        out_shape=jax.ShapeDtypeStruct((N, H, WC), jnp.float32),
        grid=(N // NB,),
        in_specs=[
            pl.BlockSpec((NB, H, WC), lambda n: (n, 0, 0)),
            w_spec,
            w_spec,
        ],
        out_specs=pl.BlockSpec((NB, H, WC), lambda n: (n, 0, 0)),
        compiler_params=pltpu.CompilerParams(
            dimension_semantics=("parallel",)),
    )(x_slab, b1_cat, b2_cat)


def resblock_forward(x_nchw, b1_cat, b2_cat, *, batch_block=None):
    """PyTorch-interface (NCHW) wrapper: boundary layout plumbing only."""
    N, C, H, W = x_nchw.shape
    WC = b1_cat.shape[-1]
    Cp = WC // W

    x = jnp.transpose(x_nchw, (0, 2, 3, 1)).astype(jnp.float32)   # NHWC
    x = jnp.pad(x, ((0, 0), (0, 0), (0, 0), (0, Cp - C)))          # pad channels
    out_slab = resblock_forward_slab(x.reshape(N, H, WC), b1_cat, b2_cat,
                                     batch_block=batch_block)
    out = out_slab.reshape(N, H, W, Cp)[..., :C]
    return jnp.transpose(out, (0, 3, 1, 2)).astype(x_nchw.dtype)


# ------------------------------- reference ----------------------------------

def _conv_ref(x_nchw, w_oihw):
    return jax.lax.conv_general_dilated(
        x_nchw, w_oihw, window_strides=(1, 1), padding=((1, 1), (1, 1)),
        dimension_numbers=("NCHW", "OIHW", "NCHW"))


def resblock_reference(x_nchw, w1_oihw, w2_oihw):
    h = jax.nn.relu(_conv_ref(x_nchw, w1_oihw))
    return _conv_ref(h, w2_oihw) + x_nchw


# ---------------------------------- main -------------------------------------

if __name__ == "__main__":
    N, C, H, W = 2, 4, 16, 16            # batch=2, out_channel=4, spatial=16
    key = jax.random.PRNGKey(0)
    kx, k1, k2 = jax.random.split(key, 3)

    x = jax.random.normal(kx, (N, C, H, W), dtype=jnp.float32)
    # Conv weights in PyTorch OIHW layout; BasicConv uses bias=False.
    w1 = jax.random.normal(k1, (C, C, 3, 3), jnp.float32) * 0.1
    w2 = jax.random.normal(k2, (C, C, 3, 3), jnp.float32) * 0.1

    # Banded bf16 weights built once per weight set (not per forward call).
    Cp = _padded_channels(C, W)          # 4 -> 8 so W*Cp = 128 (lane-dense)
    b1 = prepare_banded_weights(w1, W, Cp)
    b2 = prepare_banded_weights(w2, W, Cp)

    fwd = jax.jit(resblock_forward)
    out = jax.block_until_ready(fwd(x, b1, b2))
    ref = jax.block_until_ready(resblock_reference(x, w1, w2))

    assert out.shape == (N, C, H, W)
    # bf16 MXU inputs (f32 accumulation, f32 residual): tolerance relaxed vs
    # the pure-f32 version per review note.
    assert jnp.allclose(out, ref, rtol=2e-2, atol=2e-2)
    print("KERNEL_OK")
</pallas_src>

<mosaic_0001>
module attributes {stable_mosaic.version = 11 : i64} {
  func.func @resblock_kernel(%arg0: i32, %arg1: memref<2x16x128xf32, #tpu.memory_space<vmem>>, %arg2: memref<384x128xbf16, #tpu.memory_space<vmem>>, %arg3: memref<384x128xbf16, #tpu.memory_space<vmem>>, %arg4: memref<2x16x128xf32, #tpu.memory_space<vmem>>) attributes {dimension_semantics = [#tpu.dimension_semantics<parallel>], iteration_bounds = array<i64: 1>, scalar_prefetch = 0 : i64, scratch_operands = 0 : i64, tpu.core_type = #tpu.core_type<tc>, window_params = [{transform_indices = @transform_0, window_bounds = array<i64: 2, 16, 128>}, {pipeline_mode = #tpu.pipeline_mode<synchronous>, transform_indices = @transform_1, window_bounds = array<i64: 384, 128>}, {pipeline_mode = #tpu.pipeline_mode<synchronous>, transform_indices = @transform_2, window_bounds = array<i64: 384, 128>}, {transform_indices = @transform_3, window_bounds = array<i64: 2, 16, 128>}]} {
    %c0 = arith.constant 0 : index
    %c0_0 = arith.constant 0 : index
    %c0_1 = arith.constant 0 : index
    %0 = vector.load %arg1[%c0, %c0_0, %c0_1] : memref<2x16x128xf32, #tpu.memory_space<vmem>>, vector<2x16x128xf32>
    %cst = arith.constant 0.000000e+00 : f32
    %1 = vector.broadcast %cst : f32 to vector<2x1x128xf32>
    %2 = vector.extract_strided_slice %0 {offsets = [0, 0, 0], sizes = [2, 15, 128], strides = [1, 1, 1]} : vector<2x16x128xf32> to vector<2x15x128xf32>
    %3 = tpu.concatenate %1, %2 in 1 : vector<2x1x128xf32>, vector<2x15x128xf32> -> vector<2x16x128xf32>
    %4 = vector.extract_strided_slice %0 {offsets = [0, 1, 0], sizes = [2, 15, 128], strides = [1, 1, 1]} : vector<2x16x128xf32> to vector<2x15x128xf32>
    %5 = tpu.concatenate %4, %1 in 1 : vector<2x15x128xf32>, vector<2x1x128xf32> -> vector<2x16x128xf32>
    %6 = tpu.concatenate %3, %0, %5 in 2 : vector<2x16x128xf32>, vector<2x16x128xf32>, vector<2x16x128xf32> -> vector<2x16x384xf32>
    %7 = vector.shape_cast %6 : vector<2x16x384xf32> to vector<32x384xf32>
    %8 = arith.truncf %7 : vector<32x384xf32> to vector<32x384xbf16>
    %c0_2 = arith.constant 0 : index
    %c0_3 = arith.constant 0 : index
    %9 = vector.load %arg2[%c0_2, %c0_3] : memref<384x128xbf16, #tpu.memory_space<vmem>>, vector<384x128xbf16>
    %cst_4 = arith.constant dense<0.000000e+00> : vector<32x128xf32>
    %10 = tpu.matmul %8, %9, %cst_4 {dimension_numbers = #tpu.dot_dimension_numbers<[1], [0], [0], [1], [0, 0, 1, 1], [], []>} : vector<32x384xbf16>, vector<384x128xbf16>, vector<32x128xf32> -> vector<32x128xf32>
    %cst_5 = arith.constant 0.000000e+00 : f32
    %11 = vector.broadcast %cst_5 : f32 to vector<32x128xf32>
    %12 = arith.maximumf %10, %11 : vector<32x128xf32>
    %13 = vector.shape_cast %12 : vector<32x128xf32> to vector<2x16x128xf32>
    %cst_6 = arith.constant 0.000000e+00 : f32
    %14 = vector.broadcast %cst_6 : f32 to vector<2x1x128xf32>
    %15 = vector.extract_strided_slice %13 {offsets = [0, 0, 0], sizes = [2, 15, 128], strides = [1, 1, 1]} : vector<2x16x128xf32> to vector<2x15x128xf32>
    %16 = tpu.concatenate %14, %15 in 1 : vector<2x1x128xf32>, vector<2x15x128xf32> -> vector<2x16x128xf32>
    %17 = vector.extract_strided_slice %13 {offsets = [0, 1, 0], sizes = [2, 15, 128], strides = [1, 1, 1]} : vector<2x16x128xf32> to vector<2x15x128xf32>
    %18 = tpu.concatenate %17, %14 in 1 : vector<2x15x128xf32>, vector<2x1x128xf32> -> vector<2x16x128xf32>
    %19 = tpu.concatenate %16, %13, %18 in 2 : vector<2x16x128xf32>, vector<2x16x128xf32>, vector<2x16x128xf32> -> vector<2x16x384xf32>
    %20 = vector.shape_cast %19 : vector<2x16x384xf32> to vector<32x384xf32>
    %21 = arith.truncf %20 : vector<32x384xf32> to vector<32x384xbf16>
    %c0_7 = arith.constant 0 : index
    %c0_8 = arith.constant 0 : index
    %22 = vector.load %arg3[%c0_7, %c0_8] : memref<384x128xbf16, #tpu.memory_space<vmem>>, vector<384x128xbf16>
    %cst_9 = arith.constant dense<0.000000e+00> : vector<32x128xf32>
    %23 = tpu.matmul %21, %22, %cst_9 {dimension_numbers = #tpu.dot_dimension_numbers<[1], [0], [0], [1], [0, 0, 1, 1], [], []>} : vector<32x384xbf16>, vector<384x128xbf16>, vector<32x128xf32> -> vector<32x128xf32>
    %24 = vector.shape_cast %23 : vector<32x128xf32> to vector<2x16x128xf32>
    %25 = arith.addf %24, %0 : vector<2x16x128xf32>
    %c0_10 = arith.constant 0 : index
    %c0_11 = arith.constant 0 : index
    %c0_12 = arith.constant 0 : index
    %26 = vector.load %arg4[%c0_10, %c0_11, %c0_12] : memref<2x16x128xf32, #tpu.memory_space<vmem>>, vector<2x16x128xf32>
    tpu.vector_store %arg4[%c0_10, %c0_11, %c0_12], %25 {strides = array<i32>} : memref<2x16x128xf32, #tpu.memory_space<vmem>>, vector<2x16x128xf32>,
    return
  }
  func.func @transform_0(%arg0: i32) -> (i32, i32, i32) {
    %c0_i32 = arith.constant 0 : i32
    %c0_i32_0 = arith.constant 0 : i32
    %c0_i32_1 = arith.constant 0 : i32
    return %arg0, %c0_i32, %c0_i32_0 : i32, i32, i32
  }
  func.func @transform_1(%arg0: i32) -> (i32, i32) {
    %c0_i32 = arith.constant 0 : i32
    %c0_i32_0 = arith.constant 0 : i32
    %c0_i32_1 = arith.constant 0 : i32
    return %c0_i32, %c0_i32_0 : i32, i32
  }
  func.func @transform_2(%arg0: i32) -> (i32, i32) {
    %c0_i32 = arith.constant 0 : i32
    %c0_i32_0 = arith.constant 0 : i32
    %c0_i32_1 = arith.constant 0 : i32
    return %c0_i32, %c0_i32_0 : i32, i32
  }
  func.func @transform_3(%arg0: i32) -> (i32, i32, i32) {
    %c0_i32 = arith.constant 0 : i32
    %c0_i32_0 = arith.constant 0 : i32
    %c0_i32_1 = arith.constant 0 : i32
    return %arg0, %c0_i32, %c0_i32_0 : i32, i32, i32
  }
}

</mosaic_0001>

<bundles_post_ra>
// kernel: resblock_forward.1
= control target key start
LH: loop header
LB: loop body
LE: loop exit
PB: predicated region body
PF: predicated region fallthrough
CT: control target
= control target key end

     0   :  { %vm22_vm0 = vcmask 1040384   ;;  %vm35_vm1 = vcmask 1046528   ;;  %vm887_vm3 = vmmov 1   ;;  %s1142_s1 = inlined_call_operand.vmem [shape: bf16[384,128], index: 1, kind: input, shape index: {}]   ;;  %s1143_s0 = inlined_call_operand.vmem [shape: f32[2,16,128], index: 0, kind: input, shape index: {}]   ;;  %s1144_s2 = inlined_call_operand.vmem [shape: bf16[384,128], index: 2, kind: input, shape index: {}]   ;;  %s1145_s3 = inlined_call_operand.vmem [shape: f32[2,16,128], index: 3, kind: output, shape index: {}]  }
   0x1   :  { %v829_v0 = vld [vmem:[%s1142_s1 + $0x38] sm:$0xff]  ;;  %v828_v3 = vld [vmem:[%s1142_s1 + $0x30] sm:$0xff]  ;;  %v827_v6 = vld [vmem:[%s1142_s1 + $0x28] sm:$0xff] }
   0x2   :  { %v837_v1 = vld [vmem:[%s1142_s1 + $0x78] sm:$0xff]  ;;  %246 = vmatpush.bf16.msra.mxu0 %v829_v0  ;;  %v836_v4 = vld [vmem:[%s1142_s1 + $0x70] sm:$0xff]  ;;  %v835_v7 = vld [vmem:[%s1142_s1 + $0x68] sm:$0xff] }
   0x3   :  { %v845_v2 = vld [vmem:[%s1142_s1 + $0xb8] sm:$0xff]  ;;  %265 = vmatpush.bf16.msra.mxu1 %v837_v1  ;;  %v844_v5 = vld [vmem:[%s1142_s1 + $0xb0] sm:$0xff]  ;;  %v843_v8 = vld [vmem:[%s1142_s1 + $0xa8] sm:$0xff] }
   0x4   :  { %284 = vmatpush.bf16.msra.mxu2 %v845_v2  ;;  %v826_v9 = vld [vmem:[%s1142_s1 + $0x20] sm:$0xff]  ;;  %v825_v12 = vld [vmem:[%s1142_s1 + $0x18] sm:$0xff]  ;;  %v824_v15 = vld [vmem:[%s1142_s1 + $0x10] sm:$0xff] }
   0x5   :  { %v834_v10 = vld [vmem:[%s1142_s1 + $0x60] sm:$0xff]  ;;  %v833_v13 = vld [vmem:[%s1142_s1 + $0x58] sm:$0xff]  ;;  %v832_v16 = vld [vmem:[%s1142_s1 + $0x50] sm:$0xff] }
   0x6   :  { %247 = vmatpush.bf16.msra.mxu0 %v828_v3  ;;  %v842_v11 = vld [vmem:[%s1142_s1 + $0xa0] sm:$0xff]  ;;  %v841_v14 = vld [vmem:[%s1142_s1 + $0x98] sm:$0xff]  ;;  %v840_v18 = vld [vmem:[%s1142_s1 + $0x90] sm:$0xff] }
   0x7   :  { %266 = vmatpush.bf16.msra.mxu1 %v836_v4  ;;  %v853_v17 = vld [vmem:[%s1144_s2 + $0x38] sm:$0xff]  ;;  %v968_v19 = vld [vmem:[%s1143_s0] sm:$0xff]  ;;  %v973_v20 = vld [vmem:[%s1143_s0 + $0x8] sm:$0xff] }
   0x8   :  { %285 = vmatpush.bf16.msra.mxu2 %v844_v5  ;;  %533 = vmatpush.bf16.msra.mxu3 %v853_v17  ;;  %v852_v21 = vld [vmem:[%s1144_s2 + $0x30] sm:$0xff]  ;;  %v823_v22 = vld [vmem:[%s1142_s1 + $0x8] sm:$0xff]  ;;  %v23_v24 = vrot.slane %v968_v19, 7  ;;  %v24_v25 = vrot.slane %v973_v20, 7  ;;  %v36_v27 = vrot.slane %v968_v19, 1  ;;  %v37_v28 = vrot.slane %v973_v20, 1  ;;  %vm698_vm2 = vmneg %vm22_vm0 }
   0x9   :  { %v831_v23 = vld [vmem:[%s1142_s1 + $0x48] sm:$0xff]  ;;  %v822_v29 = vld [vmem:[%s1142_s1] sm:$0xff]  ;;  %v861_v34 = vld [vmem:[%s1144_s2 + $0x78] sm:$0xff]  ;;  %v49_v37 = vpack.c.bf16 %v973_v20, %v968_v19 }
   0xa   :  { %248 = vmatpush.bf16.msra.mxu0 %v827_v6  ;;  %v839_v26 = vld [vmem:[%s1142_s1 + $0x88] sm:$0xff]  ;;  %v830_v30 = vld [vmem:[%s1142_s1 + $0x40] sm:$0xff]  ;;  %v25_v31 = vsel %vm22_vm0, %v23_v24, %v24_v25  ;;  %v38_v33 = vsel %vm35_vm1, %v36_v27, %v37_v28  ;;  %v1009_v35 = vld [vmem:[%s1144_s2 + $0xb8] sm:$0xff] }
   0xb   :  { %267 = vmatpush.bf16.msra.mxu1 %v835_v7  ;;  %v838_v32 = vld [vmem:[%s1142_s1 + $0x80] sm:$0xff]  ;;  %v700_v36 = vpack.c.bf16 %v25_v31, %v23_v24  ;;  %vm1013_vm4 = vmpackc.low %vm887_vm3, %vm698_vm2  ;;  %v707_v39 = vpack.c.bf16 %v37_v28, %v38_v33  ;;  %v860_v41 = vld [vmem:[%s1144_s2 + $0x70] sm:$0xff] }
   0xc   :  { %286 = vmatpush.bf16.msra.mxu2 %v843_v8  ;;  %534 = vmatpush.bf16.msra.mxu3 %v852_v21  ;;  %vm1018_vm5 = vmpackc.low %vm35_vm1, %vm887_vm3  ;;  %v1029_v42 = vld [vmem:[%s1144_s2 + $0xb0] sm:$0xff]  ;;  %v1043_v44 = vld [vmem:[%s1143_s0 + $0x18] sm:$0xff] }
   0xd   :  { %v1038_v43 = vld [vmem:[%s1143_s0 + $0x10] sm:$0xff]  ;;  %v859_v45 = vld [vmem:[%s1144_s2 + $0x68] sm:$0xff]  ;;  %v27_v47 = vrot.slane %v1043_v44, 7  ;;  %v40_v49 = vrot.slane %v1043_v44, 1  ;;  %v858_v57 = vld [vmem:[%s1144_s2 + $0x60] sm:$0xff] }
   0xe   :  { %249 = vmatpush.bf16.msra.mxu0 %v826_v9  ;;  %v26_v46 = vrot.slane %v1038_v43, 7  ;;  %v39_v48 = vrot.slane %v1038_v43, 1  ;;  %v52_v53 = vpack.c.bf16 %v1043_v44, %v1038_v43  ;;  %v851_v55 = vld [vmem:[%s1144_s2 + $0x28] sm:$0xff]  ;;  %v850_v58 = vld [vmem:[%s1144_s2 + $0x20] sm:$0xff]  ;;  %v857_v60 = vld [vmem:[%s1144_s2 + $0x58] sm:$0xff] }
   0xf   :  { %268 = vmatpush.bf16.msra.mxu1 %v834_v10  ;;  %v867_v56 = vld [vmem:[%s1144_s2 + $0xa8] sm:$0xff]  ;;  %v866_v59 = vld [vmem:[%s1144_s2 + $0xa0] sm:$0xff]  ;;  %v849_v61 = vld [vmem:[%s1144_s2 + $0x18] sm:$0xff] }
  0x10   :  { %287 = vmatpush.bf16.msra.mxu2 %v842_v11  ;;  %v28_v50 = vsel %vm22_vm0, %v26_v46, %v27_v47  ;;  %v41_v51 = vsel %vm35_vm1, %v39_v48, %v40_v49  ;;  %535 = vmatpush.bf16.msra.mxu3 %v851_v55  ;;  %v865_v62 = vld [vmem:[%s1144_s2 + $0x98] sm:$0xff]  ;;  %v856_v63 = vld [vmem:[%s1144_s2 + $0x50] sm:$0xff]  ;;  %v855_v2 = vld [vmem:[%s1144_s2 + $0x48] sm:$0xff] }
  0x11   :  { %v704_v52 = vpack.c.bf16 %v28_v50, %v26_v46  ;;  %v710_v54 = vpack.c.bf16 %v40_v49, %v41_v51  ;;  %v848_v0 = vld [vmem:[%s1144_s2 + $0x10] sm:$0xff]  ;;  %v847_v3 = vld [vmem:[%s1144_s2 + $0x8] sm:$0xff]  ;;  %v854_v5 = vld [vmem:[%s1144_s2 + $0x40] sm:$0xff] }
  0x12   :  { %250 = vmatpush.bf16.msra.mxu0 %v825_v12  ;;  %v864_v1 = vld [vmem:[%s1144_s2 + $0x90] sm:$0xff]  ;;  %v863_v4 = vld [vmem:[%s1144_s2 + $0x88] sm:$0xff]  ;;  %v846_v6 = vld [vmem:[%s1144_s2] sm:$0xff] }
  0x13   :  { %269 = vmatpush.bf16.msra.mxu1 %v833_v13  ;;  %v862_v7 = vld [vmem:[%s1144_s2 + $0x80] sm:$0xff] }
  0x14   :  { %288 = vmatpush.bf16.msra.mxu2 %v841_v14  ;;  %536 = vmatpush.bf16.msra.mxu3 %v850_v58 }
  0x16   :  { %251 = vmatpush.bf16.msra.mxu0 %v824_v15 }
  0x17   :  { %270 = vmatpush.bf16.msra.mxu1 %v832_v16 }
  0x18   :  { %289 = vmatpush.bf16.msra.mxu2 %v840_v18  ;;  %537 = vmatpush.bf16.msra.mxu3 %v849_v61 }
  0x1a   :  { %252 = vmatpush.bf16.msra.mxu0 %v823_v22 }
  0x1b   :  { %271 = vmatpush.bf16.msra.mxu1 %v831_v23 }
  0x1c   :  { %290 = vmatpush.bf16.msra.mxu2 %v839_v26  ;;  %538 = vmatpush.bf16.msra.mxu3 %v848_v0 }
  0x1e   :  { %253 = vmatpush.bf16.msra.mxu0 %v822_v29 }
  0x1f   :  { %272 = vmatpush.bf16.msra.mxu1 %v830_v30 }
  0x20   :  { %291 = vmatpush.bf16.msra.mxu2 %v838_v32  ;;  %539 = vmatpush.bf16.msra.mxu3 %v847_v3 }
  0x21   :  { %701 = vmatmul.msk.bf16.vlgmr.msra.gmra.mxu0 %vm1013_vm4, %v700_v36 }
  0x22   :  { %552 = vmatpush.bf16.msrb.mxu0 %v861_v34  ;;  %273 = vmatmul.bf16.vlgmr.msra.gmra.mxu1 %v49_v37 }
  0x23   :  { %571 = vmatpush.bf16.msrb.mxu1 %v1009_v35  ;;  %708 = vmatmul.msk.bf16.vlgmr.msra.gmra.mxu2 %vm1018_vm5, %v707_v39 }
  0x24   :  { %870 = vmatpush.bf16.msrb.mxu2 %v861_v34  ;;  %540 = vmatpush.bf16.msra.mxu3 %v846_v6 }
  0x26   :  { %553 = vmatpush.bf16.msrb.mxu0 %v860_v41 }
  0x27   :  { %572 = vmatpush.bf16.msrb.mxu1 %v1029_v42 }
  0x28   :  { %871 = vmatpush.bf16.msrb.mxu2 %v860_v41  ;;  %878 = vmatpush.bf16.msrb.mxu3 %v1009_v35 }
  0x2a   :  { %554 = vmatpush.bf16.msrb.mxu0 %v859_v45 }
  0x2b   :  { %573 = vmatpush.bf16.msrb.mxu1 %v867_v56 }
  0x2c   :  { %872 = vmatpush.bf16.msrb.mxu2 %v859_v45  ;;  %879 = vmatpush.bf16.msrb.mxu3 %v1029_v42 }
  0x2e   :  { %555 = vmatpush.bf16.msrb.mxu0 %v858_v57 }
  0x2f   :  { %574 = vmatpush.bf16.msrb.mxu1 %v866_v59 }
  0x30   :  { %873 = vmatpush.bf16.msrb.mxu2 %v858_v57  ;;  %880 = vmatpush.bf16.msrb.mxu3 %v867_v56 }
  0x31   :  { %705 = vmatmul.msk.bf16.gmra.mxu0 %vm1013_vm4, %v704_v52 }
  0x32   :  { %278 = vmatmul.bf16.gmra.mxu1 %v52_v53  ;;  %556 = vmatpush.bf16.msrb.mxu0 %v857_v60 }
  0x33   :  { %711 = vmatmul.msk.bf16.gmra.mxu2 %vm1018_vm5, %v710_v54  ;;  %575 = vmatpush.bf16.msrb.mxu1 %v865_v62 }
  0x34   :  { %874 = vmatpush.bf16.msrb.mxu2 %v857_v60  ;;  %881 = vmatpush.bf16.msrb.mxu3 %v866_v59 }
  0x36   :  { %557 = vmatpush.bf16.msrb.mxu0 %v856_v63 }
  0x37   :  { %576 = vmatpush.bf16.msrb.mxu1 %v864_v1 }
  0x38   :  { %875 = vmatpush.bf16.msrb.mxu2 %v856_v63  ;;  %882 = vmatpush.bf16.msrb.mxu3 %v865_v62 }
  0x3a   :  { %558 = vmatpush.bf16.msrb.mxu0 %v855_v2 }
  0x3b   :  { %577 = vmatpush.bf16.msrb.mxu1 %v863_v4 }
  0x3c   :  { %876 = vmatpush.bf16.msrb.mxu2 %v855_v2  ;;  %883 = vmatpush.bf16.msrb.mxu3 %v864_v1 }
  0x3e   :  { %559 = vmatpush.bf16.msrb.mxu0 %v854_v5 }
  0x3f   :  { %578 = vmatpush.bf16.msrb.mxu1 %v862_v7 }
  0x40   :  { %877 = vmatpush.bf16.msrb.mxu2 %v854_v5  ;;  %884 = vmatpush.bf16.msrb.mxu3 %v863_v4 }
  0x44   :  { %885 = vmatpush.bf16.msrb.mxu3 %v862_v7 }
  0x9e   :  { %v255_v8 = vpop.f32.mrf.mxu0 }
  0x9f   :  { %v274_v9 = vpop.f32.mrf.mxu1 }
  0xa0   :  { %v275_v10 = vadd.f32 %v274_v9, %v255_v8 }
  0xa6   :  { %v293_v11 = vpop.f32.mrf.mxu2  ;;  %v257_v12 = vpop.f32.mrf.mxu0 }
  0xa7   :  { %v276_v13 = vpop.f32.mrf.mxu1  ;;  %v294_v14 = vadd.f32 %v293_v11, %v275_v10 }
  0xa8   :  { %v277_v15 = vadd.f32 %v276_v13, %v257_v12 }
  0xa9   :  { %v303_v16 = vmax.f32 %v294_v14, 0.0 }
  0xab   :  { %v311_v24 = vrot.slane %v303_v16, 7  ;;  %v323_v25 = vrot.slane %v303_v16, 1 }
  0xae   :  { %v295_v17 = vpop.f32.mrf.mxu2  ;;  %v260_v21 = vpop.f32.mrf.mxu0 }
  0xaf   :  { %v296_v18 = vadd.f32 %v295_v17, %v277_v15  ;;  %v279_v22 = vpop.f32.mrf.mxu1 }
  0xb0   :  { %v280_v34 = vadd.f32 %v279_v22, %v260_v21 }
  0xb1   :  { %v304_v23 = vmax.f32 %v296_v18, 0.0 }
  0xb3   :  { %v312_v26 = vrot.slane %v304_v23, 7  ;;  %v324_v27 = vrot.slane %v304_v23, 1  ;;  %v336_v28 = vpack.c.bf16 %v304_v23, %v303_v16 }
  0xb5   :  { %560 = vmatmul.bf16.vlgmr.msrb.gmra.mxu0 %v336_v28  ;;  %v313_v29 = vsel %vm22_vm0, %v311_v24, %v312_v26  ;;  %v325_v30 = vsel %vm35_vm1, %v323_v25, %v324_v27 }
  0xb6   :  { %v298_v31 = vpop.f32.mrf.mxu2  ;;  %v810_v32 = vpack.c.bf16 %v313_v29, %v311_v24  ;;  %v817_v33 = vpack.c.bf16 %v324_v27, %v325_v30  ;;  %v262_v35 = vpop.f32.mrf.mxu0 }
  0xb7   :  { %v281_v36 = vpop.f32.mrf.mxu1  ;;  %v299_v37 = vadd.f32 %v298_v31, %v280_v34 }
  0xb8   :  { %811 = vmatmul.msk.bf16.vlgmr.msra.gmra.mxu3 %vm1013_vm4, %v810_v32  ;;  %818 = vmatmul.msk.bf16.vlgmr.msrb.gmra.mxu1 %vm1018_vm5, %v817_v33  ;;  %v282_v39 = vadd.f32 %v281_v36, %v262_v35 }
  0xb9   :  { %v305_v42 = vmax.f32 %v299_v37, 0.0 }
  0xbb   :  { %v314_v47 = vrot.slane %v305_v42, 7  ;;  %v326_v53 = vrot.slane %v305_v42, 1 }
  0xbe   :  { %v300_v41 = vpop.f32.mrf.mxu2 }
  0xbf   :  { %v301_v45 = vadd.f32 %v300_v41, %v282_v39 }
  0xc1   :  { %v306_v46 = vmax.f32 %v301_v45, 0.0 }
  0xc3   :  { %v315_v48 = vrot.slane %v306_v46, 7  ;;  %v339_v49 = vpack.c.bf16 %v306_v46, %v305_v42  ;;  %v327_v52 = vrot.slane %v306_v46, 1 }
  0xc5   :  { %565 = vmatmul.bf16.vlgmr.msrb.gmra.mxu2 %v339_v49  ;;  %v316_v50 = vsel %vm22_vm0, %v314_v47, %v315_v48  ;;  %v328_v54 = vsel %vm35_vm1, %v326_v53, %v327_v52 }
  0xc6   :  { %v814_v51 = vpack.c.bf16 %v316_v50, %v314_v47  ;;  %v820_v55 = vpack.c.bf16 %v327_v52, %v328_v54 }
  0xc8   :  { %815 = vmatmul.msk.bf16.gmra.mxu3 %vm1013_vm4, %v814_v51 }
  0xd8   :  { %821 = vmatmul.msk.bf16.vlgmr.msrb.gmra.mxu3 %vm1018_vm5, %v820_v55 }
 0x132   :  { %v561_v56 = vpop.f32.mrf.mxu0 }
 0x135   :  { %v580_v57 = vpop.f32.mrf.mxu1 }
 0x13a   :  { %v563_v38 = vpop.f32.mrf.mxu0 }
 0x13b   :  { %v542_v58 = vpop.f32.mrf.mxu3 }
 0x13c   :  { %v562_v59 = vadd.f32 %v561_v56, %v542_v58 }
 0x13d   :  { %v582_v0 = vpop.f32.mrf.mxu1 }
 0x13e   :  { %v581_v60 = vadd.f32 %v580_v57, %v562_v59 }
 0x140   :  { %v590_v61 = vadd.f32 %v581_v60, %v968_v19 }
 0x142   :  { %594 = vst [vmem:[%s1145_s3] sm:$0xff] %v590_v61 }
 0x143   :  { %v544_v62 = vpop.f32.mrf.mxu3 }
 0x144   :  { %v564_v63 = vadd.f32 %v563_v38, %v544_v62 }
 0x146   :  { %v583_v1 = vadd.f32 %v582_v0, %v564_v63 }
 0x148   :  { %v591_v2 = vadd.f32 %v583_v1, %v973_v20  ;;  %v566_v4 = vpop.f32.mrf.mxu2 }
 0x14a   :  { %595 = vst [vmem:[%s1145_s3 + $0x8] sm:$0xff] %v591_v2 }
 0x14b   :  { %v547_v40 = vpop.f32.mrf.mxu3 }
 0x14c   :  { %v567_v5 = vadd.f32 %v566_v4, %v547_v40 }
 0x150   :  { %v568_v8 = vpop.f32.mrf.mxu2 }
 0x153   :  { %v549_v3 = vpop.f32.mrf.mxu3 }
 0x154   :  { %v569_v9 = vadd.f32 %v568_v8, %v549_v3 }
 0x15b   :  { %v585_v19 = vpop.f32.mrf.mxu3 }
 0x15c   :  { %v586_v6 = vadd.f32 %v585_v19, %v567_v5 }
 0x15e   :  { %v592_v7 = vadd.f32 %v586_v6, %v1038_v43 }
 0x160   :  { %596 = vst [vmem:[%s1145_s3 + $0x10] sm:$0xff] %v592_v7 }
 0x163   :  { %v587_v10 = vpop.f32.mrf.mxu3 }
 0x164   :  { %v588_v20 = vadd.f32 %v587_v10, %v569_v9 }
 0x166   :  { %v593_v11 = vadd.f32 %v588_v20, %v1043_v44 }
 0x168   :  { %597 = vst [vmem:[%s1145_s3 + $0x18] sm:$0xff] %v593_v11 }

</bundles_post_ra>
